<compile_context>
chip_gen: v7x
topology: tpu7x:2x2x1
jax: 0.10.0
libtpu: 0.0.40
codegen_flags: <defaults>
</compile_context>

<pallas_src>
import functools
import math

import jax
import jax.numpy as jnp
import numpy as np
from jax import lax
from jax.experimental import pallas as pl
from jax.experimental.pallas import tpu as pltpu


def _layernorm(v, g, b, eps=1e-5):
    mu = jnp.mean(v, axis=-1, keepdims=True)
    var = jnp.mean((v - mu) ** 2, axis=-1, keepdims=True)
    return (v - mu) * lax.rsqrt(var + eps) * g + b


def _gelu_exact(v):
    # nn.GELU() default = exact erf-based GELU
    return 0.5 * v * (1.0 + lax.erf(v * 0.7071067811865476))


# ---------------- pass 1: LayerNorm1 + fused QKV projection ----------------
def qkv_kernel(x_ref, ln1g_ref, ln1b_ref, wqkv_ref, bqkv_ref,
               q_ref, k_ref, v_ref, *, n_head):
    x = x_ref[0].astype(jnp.float32)                       # (TQ, C) — f32 LN stats
    C = x.shape[-1]
    hd = C // n_head
    h = _layernorm(x, ln1g_ref[...], ln1b_ref[...]).astype(x_ref.dtype)
    # single fused (C, 3C) matmul instead of 3 separate QKV matmuls
    qkv = jnp.dot(h, wqkv_ref[...], preferred_element_type=jnp.float32)
    qkv = (qkv + bqkv_ref[...]).astype(q_ref.dtype)        # (TQ, 3C)
    for hh in range(n_head):                               # static loop: head-major scatter
        q_ref[0, hh] = qkv[:, hh * hd:(hh + 1) * hd]
        k_ref[0, hh] = qkv[:, C + hh * hd: C + (hh + 1) * hd]
        v_ref[0, hh] = qkv[:, 2 * C + hh * hd: 2 * C + (hh + 1) * hd]


# ------- pass 2: flash attention + out-proj + residual + LN2 + MLP + residual -------
def attn_mlp_kernel(qi_ref, ki_ref,                        # scalar-prefetch step tables (SMEM)
                    x_ref, q_ref, k_ref, v_ref,
                    wo_ref, bo_ref, ln2g_ref, ln2b_ref,
                    w1_ref, b1_ref, w2_ref, b2_ref,
                    o_ref,
                    m_scr, l_scr, acc_scr,
                    *, n_head, sm_scale, tq, tk, n_mlp_chunks):
    s_idx = pl.program_id(1)
    qi = qi_ref[s_idx]                                     # query-tile index for this step
    ki = ki_ref[s_idx]                                     # kv-tile index for this step
    last_ki = ((qi + 1) * tq - 1) // tk                    # last kv block of this query tile
    H = n_head
    hd = q_ref.shape[-1]
    C = x_ref.shape[-1]
    dt = x_ref.dtype                                       # MXU operand dtype (bf16-capable)

    @pl.when(ki == 0)                                      # first kv step of this query tile
    def _init():
        m_scr[...] = jnp.full(m_scr.shape, -jnp.inf, jnp.float32)
        l_scr[...] = jnp.zeros(l_scr.shape, jnp.float32)
        acc_scr[...] = jnp.zeros(acc_scr.shape, jnp.float32)

    def _update(mask_diag):
        # head-batched contraction on the head dim — no per-head slicing, no kh.T
        s = jnp.einsum("htd,hsd->hts", q_ref[0], k_ref[0],
                       preferred_element_type=jnp.float32) * sm_scale   # (H, TQ, TK) f32
        if mask_diag:                                      # mask only where the diagonal lives
            row = qi * tq + lax.broadcasted_iota(jnp.int32, (tq, tk), 0)
            col = ki * tk + lax.broadcasted_iota(jnp.int32, (tq, tk), 1)
            s = jnp.where((row >= col)[None, :, :], s, -1e30)
        m_prev = m_scr[...]                                # (H, TQ, 1) f32
        m_new = jnp.maximum(m_prev, s.max(axis=-1, keepdims=True))
        alpha = jnp.exp(m_prev - m_new)
        p = jnp.exp(s - m_new)
        l_scr[...] = alpha * l_scr[...] + p.sum(axis=-1, keepdims=True)
        acc_scr[...] = alpha * acc_scr[...] + jnp.einsum(
            "hts,hsd->htd", p.astype(dt), v_ref[0], preferred_element_type=jnp.float32)
        m_scr[...] = m_new

    # With TK % TQ == 0, only the last kv block of each query tile touches the diagonal.
    @pl.when(ki < last_ki)          # strictly below the diagonal: no mask work at all
    def _():
        _update(mask_diag=False)

    @pl.when(ki == last_ki)         # diagonal kv block: mask, then finalize this query tile
    def _():
        _update(mask_diag=True)

        l = l_scr[...]
        inv_l = pl.reciprocal(l, approx=True)              # EUP slot
        inv_l = inv_l * (2.0 - l * inv_l)                  # one Newton step -> ~f32 accuracy
        y = acc_scr[...] * inv_l                           # (H, TQ, hd) f32

        # out-projection accumulated per head against wo reshaped to (H, hd, C):
        # no (TQ, C) repack scratch, no masked sub-128-lane stores.
        attn = bo_ref[...].astype(jnp.float32)             # (1, C) -> broadcasts
        for hh in range(H):
            attn = attn + jnp.dot(y[hh].astype(dt), wo_ref[hh],
                                  preferred_element_type=jnp.float32)

        xt = x_ref[0].astype(jnp.float32)                  # residual input, f32
        x1 = xt + attn                                     # residual 1

        h2 = _layernorm(x1, ln2g_ref[...], ln2b_ref[...]).astype(dt)

        # MLP chunked over the 4C hidden dim: bounds the live intermediate to (TQ, chunk)
        def mlp_body(j, acc):
            t = jnp.dot(h2, w1_ref[j], preferred_element_type=jnp.float32) + b1_ref[j]
            t = _gelu_exact(t).astype(dt)                  # exact erf GELU (nn.GELU default)
            return acc + jnp.dot(t, w2_ref[j], preferred_element_type=jnp.float32)

        mlp = lax.fori_loop(0, n_mlp_chunks, mlp_body,
                            jnp.zeros((tq, C), jnp.float32), unroll=True)
        o_ref[0] = (x1 + mlp + b2_ref[...]).astype(o_ref.dtype)    # residual 2


def gpt2_block(x, params, n_head, *, q_block=None, kv_block=None, mlp_chunk=512):
    (ln1g, ln1b, wqkv, bqkv, wo, bo, ln2g, ln2b, w1, b1, w2, b2) = params
    B, T, C = x.shape
    H = n_head
    assert C % H == 0
    hd = C // H

    TQ = q_block if q_block is not None else min(T, 128)
    TK = kv_block if kv_block is not None else min(T, max(TQ, 256))
    assert T % TQ == 0 and T % TK == 0, "T must be divisible by both tiles"
    assert TK % TQ == 0, "kv tile must be a multiple of the query tile (causal skipping)"
    assert TQ == T or TQ % 8 == 0, "query tile must be a multiple of 8 (sublanes)"
    assert TK == T or TK % 8 == 0, "kv tile must be a multiple of 8 (sublanes)"
    nq = T // TQ

    hidden = 4 * C
    ck = min(hidden, mlp_chunk)
    assert hidden % ck == 0
    n_ck = hidden // ck

    dt = x.dtype
    itemsize = jnp.dtype(dt).itemsize

    # Matmul operands follow the activation dtype (bf16 when the caller passes bf16);
    # LN params and biases stay f32 (they feed f32 paths).
    wqkv_c = wqkv.astype(dt)
    wo_r = wo.reshape(H, hd, C).astype(dt)                          # (H, hd, C)
    w1_r = w1.reshape(C, n_ck, ck).transpose(1, 0, 2).astype(dt)    # (n_ck, C, ck)
    b1_r = b1.reshape(1, n_ck, ck).transpose(1, 0, 2)               # (n_ck, 1, ck), f32
    w2_r = w2.reshape(n_ck, ck, C).astype(dt)                       # (n_ck, ck, C)

    # grid-invariant parameter blocks (index always 0: fetched once, not re-DMA'd)
    def full_spec(a):
        return pl.BlockSpec(a.shape, lambda *args, _nd=a.ndim: (0,) * _nd)
    # TODO(synk): on v7x add pipeline_mode=pl.Buffered(1) to full_spec (single-buffer the
    # resident weights, halving their VMEM) once confirmed supported by the installed jax.

    # Raise the scoped-VMEM cap only when the resident weights actually need it
    # (128-MiB parts v4/v5e/v6e get a higher cap than v7x's 64 MiB VMEM).
    compiler_kwargs = {}
    resident_weight_bytes = (9 * C * C + 3 * C * C) * itemsize
    if resident_weight_bytes > (4 << 20):
        try:
            kind = jax.devices()[0].device_kind.lower()
        except Exception:
            kind = ""
        compiler_kwargs["vmem_limit_bytes"] = (48 if "v7" in kind else 96) << 20

    # ---- pass 1: LN1 + fused QKV -> head-major Q/K/V (B, H, T, hd) ----
    cost1 = pl.CostEstimate(
        flops=int(2 * B * T * C * 3 * C),
        transcendentals=int(B * T),
        bytes_accessed=int(itemsize * (4 * B * T * C + 3 * C * C) + 4 * (8 * C)))
    q, k, v = pl.pallas_call(
        functools.partial(qkv_kernel, n_head=H),
        out_shape=tuple(jax.ShapeDtypeStruct((B, H, T, hd), dt) for _ in range(3)),
        grid_spec=pltpu.PrefetchScalarGridSpec(
            num_scalar_prefetch=0,
            grid=(B, nq),
            in_specs=[
                pl.BlockSpec((1, TQ, C), lambda b, i: (b, i, 0)),   # x tile
                full_spec(ln1g), full_spec(ln1b),                   # ln1 gamma/beta
                full_spec(wqkv_c), full_spec(bqkv),                 # fused QKV weight/bias
            ],
            out_specs=[pl.BlockSpec((1, H, TQ, hd), lambda b, i: (b, 0, i, 0))
                       for _ in range(3)],
        ),
        compiler_params=pltpu.CompilerParams(
            dimension_semantics=("parallel", "parallel"), **compiler_kwargs),
        cost_estimate=cost1,
    )(x, ln1g, ln1b, wqkv_c, bqkv)

    # ---- pass 2: flattened lower-triangular (qi, ki) step tables (scalar prefetch) ----
    qi_list, ki_list = [], []
    for qi_i in range(nq):
        for ki_i in range(((qi_i + 1) * TQ - 1) // TK + 1):   # only causal kv blocks
            qi_list.append(qi_i)
            ki_list.append(ki_i)
    steps = len(qi_list)
    qi_arr = jnp.asarray(qi_list, dtype=jnp.int32)
    ki_arr = jnp.asarray(ki_list, dtype=jnp.int32)

    x_map = lambda b, s, qi, ki: (b, qi[s], 0)
    q_map = lambda b, s, qi, ki: (b, 0, qi[s], 0)
    kv_map = lambda b, s, qi, ki: (b, 0, ki[s], 0)

    cost2 = pl.CostEstimate(
        flops=int(4 * B * H * steps * TQ * TK * hd + 18 * B * T * C * C),
        transcendentals=int(B * H * steps * TQ * TK + B * T * (4 * C + 2)),
        bytes_accessed=int(itemsize * (3 * B * T * C + B * T * C
                                       + 2 * B * steps * TK * C + 9 * C * C)))

    out = pl.pallas_call(
        functools.partial(attn_mlp_kernel, n_head=H, sm_scale=1.0 / math.sqrt(hd),
                          tq=TQ, tk=TK, n_mlp_chunks=n_ck),
        out_shape=jax.ShapeDtypeStruct((B, T, C), dt),
        grid_spec=pltpu.PrefetchScalarGridSpec(
            num_scalar_prefetch=2,
            grid=(B, steps),
            in_specs=[
                pl.BlockSpec((1, TQ, C), x_map),                    # x (residual input)
                pl.BlockSpec((1, H, TQ, hd), q_map),                # Q tile
                pl.BlockSpec((1, H, TK, hd), kv_map),               # K block
                pl.BlockSpec((1, H, TK, hd), kv_map),               # V block
                full_spec(wo_r), full_spec(bo),                     # out-proj
                full_spec(ln2g), full_spec(ln2b),                   # ln2
                full_spec(w1_r), full_spec(b1_r),                   # MLP up (chunked)
                full_spec(w2_r), full_spec(b2),                     # MLP down (chunked)
            ],
            out_specs=pl.BlockSpec((1, TQ, C), x_map),
            scratch_shapes=[
                pltpu.VMEM((H, TQ, 1), jnp.float32),    # running max  m
                pltpu.VMEM((H, TQ, 1), jnp.float32),    # running sum  l
                pltpu.VMEM((H, TQ, hd), jnp.float32),   # attention accumulator
            ],
        ),
        compiler_params=pltpu.CompilerParams(
            dimension_semantics=("parallel", "arbitrary"), **compiler_kwargs),
        cost_estimate=cost2,
    )(qi_arr, ki_arr, x, q, k, v, wo_r, bo, ln2g, ln2b, w1_r, b1_r, w2_r, b2)
    return out


# ---------------- pure-JAX reference for verification ----------------
def ref_block(x, params, n_head):
    (ln1g, ln1b, wqkv, bqkv, wo, bo, ln2g, ln2b, w1, b1, w2, b2) = params
    B, T, C = x.shape
    hd = C // n_head
    h = _layernorm(x, ln1g, ln1b)
    qkv = h @ wqkv + bqkv
    q, k, v = jnp.split(qkv, 3, axis=-1)
    q = q.reshape(B, T, n_head, hd).transpose(0, 2, 1, 3)
    k = k.reshape(B, T, n_head, hd).transpose(0, 2, 1, 3)
    v = v.reshape(B, T, n_head, hd).transpose(0, 2, 1, 3)
    att = jnp.einsum("bhtd,bhsd->bhts", q, k) / math.sqrt(hd)
    mask = jnp.tril(jnp.ones((T, T), dtype=bool))
    att = jnp.where(mask, att, -1e30)
    att = jax.nn.softmax(att, axis=-1)
    y = jnp.einsum("bhts,bhsd->bhtd", att, v).transpose(0, 2, 1, 3).reshape(B, T, C)
    x1 = x + (y @ wo + bo)
    h2 = _layernorm(x1, ln2g, ln2b)
    m = _gelu_exact(h2 @ w1 + b1) @ w2 + b2
    return x1 + m


if __name__ == "__main__":
    # Small module-consistent shapes.  T=32 with q_block=8, kv_block=16 exercises
    # TK != TQ, the flattened triangular grid (1- and 2-block kv sweeps), the
    # online-softmax accumulators and the chunked-MLP loop (mlp_chunk=64 -> 2 chunks).
    B, T = 2, 32
    n_embd, n_head, block_size = 32, 4, 32
    attn_pdrop = resid_pdrop = 0.1          # identity at inference -> not applied

    key = jax.random.PRNGKey(0)
    ks = jax.random.split(key, 12)
    f32 = jnp.float32
    C = n_embd

    x = jax.random.normal(ks[0], (B, T, C), dtype=f32)

    ln1g = 1.0 + 0.1 * jax.random.normal(ks[9], (1, C), f32)
    ln1b = 0.1 * jax.random.normal(ks[10], (1, C), f32)
    ln2g = 1.0 + 0.1 * jax.random.normal(ks[11], (1, C), f32)
    ln2b = jnp.zeros((1, C), f32)
    wqkv = jax.random.normal(ks[1], (C, 3 * C), f32) * 0.02     # fused Wq|Wk|Wv
    bqkv = jax.random.normal(ks[2], (1, 3 * C), f32) * 0.02
    wo = jax.random.normal(ks[3], (C, C), f32) * 0.02
    bo = jax.random.normal(ks[4], (1, C), f32) * 0.02
    w1 = jax.random.normal(ks[5], (C, 4 * C), f32) * 0.02
    b1 = jax.random.normal(ks[6], (1, 4 * C), f32) * 0.02
    w2 = jax.random.normal(ks[7], (4 * C, C), f32) * 0.02
    b2 = jax.random.normal(ks[8], (1, C), f32) * 0.02

    params = (ln1g, ln1b, wqkv, bqkv, wo, bo, ln2g, ln2b, w1, b1, w2, b2)

    out = gpt2_block(x, params, n_head, q_block=8, kv_block=16, mlp_chunk=64)
    out = jax.block_until_ready(out)

    ref = ref_block(x, params, n_head)
    np.testing.assert_allclose(np.asarray(out), np.asarray(ref), rtol=1e-4, atol=1e-4)

    print("KERNEL_OK")
</pallas_src>

<mosaic_0001>
module attributes {stable_mosaic.version = 11 : i64} {
  func.func @qkv_kernel(%arg0: i32, %arg1: i32, %arg2: memref<1x8x32xf32, #tpu.memory_space<vmem>>, %arg3: memref<1x32xf32, #tpu.memory_space<vmem>>, %arg4: memref<1x32xf32, #tpu.memory_space<vmem>>, %arg5: memref<32x96xf32, #tpu.memory_space<vmem>>, %arg6: memref<1x96xf32, #tpu.memory_space<vmem>>, %arg7: memref<1x4x8x8xf32, #tpu.memory_space<vmem>>, %arg8: memref<1x4x8x8xf32, #tpu.memory_space<vmem>>, %arg9: memref<1x4x8x8xf32, #tpu.memory_space<vmem>>) attributes {dimension_semantics = [#tpu.dimension_semantics<parallel>, #tpu.dimension_semantics<parallel>], iteration_bounds = array<i64: 2, 4>, scalar_prefetch = 0 : i64, scratch_operands = 0 : i64, tpu.core_type = #tpu.core_type<tc>, window_params = [{transform_indices = @transform_0, window_bounds = array<i64: 1, 8, 32>}, {pipeline_mode = #tpu.pipeline_mode<synchronous>, transform_indices = @transform_1, window_bounds = array<i64: 1, 32>}, {pipeline_mode = #tpu.pipeline_mode<synchronous>, transform_indices = @transform_2, window_bounds = array<i64: 1, 32>}, {pipeline_mode = #tpu.pipeline_mode<synchronous>, transform_indices = @transform_3, window_bounds = array<i64: 32, 96>}, {pipeline_mode = #tpu.pipeline_mode<synchronous>, transform_indices = @transform_4, window_bounds = array<i64: 1, 96>}, {transform_indices = @transform_5, window_bounds = array<i64: 1, 4, 8, 8>}, {transform_indices = @transform_6, window_bounds = array<i64: 1, 4, 8, 8>}, {transform_indices = @transform_7, window_bounds = array<i64: 1, 4, 8, 8>}]} {
    %c0 = arith.constant 0 : index
    %c0_0 = arith.constant 0 : index
    %c0_1 = arith.constant 0 : index
    %0 = vector.load %arg2[%c0, %c0_0, %c0_1] : memref<1x8x32xf32, #tpu.memory_space<vmem>>, vector<1x8x32xf32>
    %1 = vector.shape_cast %0 : vector<1x8x32xf32> to vector<8x32xf32>
    %c0_2 = arith.constant 0 : index
    %c0_3 = arith.constant 0 : index
    %2 = vector.load %arg3[%c0_2, %c0_3] : memref<1x32xf32, #tpu.memory_space<vmem>>, vector<1x32xf32>
    %c0_4 = arith.constant 0 : index
    %c0_5 = arith.constant 0 : index
    %3 = vector.load %arg4[%c0_4, %c0_5] : memref<1x32xf32, #tpu.memory_space<vmem>>, vector<1x32xf32>
    %cst = arith.constant dense<0.000000e+00> : vector<8xf32>
    %4 = vector.multi_reduction <add>, %1, %cst [1] : vector<8x32xf32> to vector<8xf32>
    %5 = vector.shape_cast %4 : vector<8xf32> to vector<8x1xf32>
    %cst_6 = arith.constant 3.200000e+01 : f32
    %6 = vector.broadcast %cst_6 : f32 to vector<8x1xf32>
    %7 = arith.divf %5, %6 : vector<8x1xf32>
    %8 = vector.broadcast %7 : vector<8x1xf32> to vector<8x32xf32>
    %9 = arith.subf %1, %8 : vector<8x32xf32>
    %10 = arith.mulf %9, %9 : vector<8x32xf32>
    %cst_7 = arith.constant dense<0.000000e+00> : vector<8xf32>
    %11 = vector.multi_reduction <add>, %10, %cst_7 [1] : vector<8x32xf32> to vector<8xf32>
    %12 = vector.shape_cast %11 : vector<8xf32> to vector<8x1xf32>
    %cst_8 = arith.constant 3.200000e+01 : f32
    %13 = vector.broadcast %cst_8 : f32 to vector<8x1xf32>
    %14 = arith.divf %12, %13 : vector<8x1xf32>
    %15 = vector.broadcast %7 : vector<8x1xf32> to vector<8x32xf32>
    %16 = arith.subf %1, %15 : vector<8x32xf32>
    %cst_9 = arith.constant 9.99999974E-6 : f32
    %17 = vector.broadcast %cst_9 : f32 to vector<8x1xf32>
    %18 = arith.addf %14, %17 : vector<8x1xf32>
    %19 = math.rsqrt %18 : vector<8x1xf32>
    %20 = vector.broadcast %19 : vector<8x1xf32> to vector<8x32xf32>
    %21 = arith.mulf %16, %20 : vector<8x32xf32>
    %22 = vector.broadcast %2 : vector<1x32xf32> to vector<8x32xf32>
    %23 = arith.mulf %21, %22 : vector<8x32xf32>
    %24 = vector.broadcast %3 : vector<1x32xf32> to vector<8x32xf32>
    %25 = arith.addf %23, %24 : vector<8x32xf32>
    %c0_10 = arith.constant 0 : index
    %c0_11 = arith.constant 0 : index
    %26 = vector.load %arg5[%c0_10, %c0_11] : memref<32x96xf32, #tpu.memory_space<vmem>>, vector<32x96xf32>
    %cst_12 = arith.constant dense<0.000000e+00> : vector<8x96xf32>
    %27 = tpu.matmul %25, %26, %cst_12 {dimension_numbers = #tpu.dot_dimension_numbers<[1], [0], [0], [1], [0, 0, 1, 1], [], []>} : vector<8x32xf32>, vector<32x96xf32>, vector<8x96xf32> -> vector<8x96xf32>
    %c0_13 = arith.constant 0 : index
    %c0_14 = arith.constant 0 : index
    %28 = vector.load %arg6[%c0_13, %c0_14] : memref<1x96xf32, #tpu.memory_space<vmem>>, vector<1x96xf32>
    %29 = vector.broadcast %28 : vector<1x96xf32> to vector<8x96xf32>
    %30 = arith.addf %27, %29 : vector<8x96xf32>
    %31 = vector.extract_strided_slice %30 {offsets = [0, 0], sizes = [8, 8], strides = [1, 1]} : vector<8x96xf32> to vector<8x8xf32>
    %c0_15 = arith.constant 0 : index
    %c0_16 = arith.constant 0 : index
    %c0_17 = arith.constant 0 : index
    %c0_18 = arith.constant 0 : index
    %32 = vector.load %arg7[%c0_15, %c0_16, %c0_17, %c0_18] : memref<1x4x8x8xf32, #tpu.memory_space<vmem>>, vector<1x1x8x8xf32>
    %33 = vector.shape_cast %32 : vector<1x1x8x8xf32> to vector<8x8xf32>
    %34 = vector.shape_cast %31 : vector<8x8xf32> to vector<1x1x8x8xf32>
    tpu.vector_store %arg7[%c0_15, %c0_16, %c0_17, %c0_18], %34 {strides = array<i32>} : memref<1x4x8x8xf32, #tpu.memory_space<vmem>>, vector<1x1x8x8xf32>,
    %35 = vector.extract_strided_slice %30 {offsets = [0, 32], sizes = [8, 8], strides = [1, 1]} : vector<8x96xf32> to vector<8x8xf32>
    %c0_19 = arith.constant 0 : index
    %c0_20 = arith.constant 0 : index
    %c0_21 = arith.constant 0 : index
    %c0_22 = arith.constant 0 : index
    %36 = vector.load %arg8[%c0_19, %c0_20, %c0_21, %c0_22] : memref<1x4x8x8xf32, #tpu.memory_space<vmem>>, vector<1x1x8x8xf32>
    %37 = vector.shape_cast %36 : vector<1x1x8x8xf32> to vector<8x8xf32>
    %38 = vector.shape_cast %35 : vector<8x8xf32> to vector<1x1x8x8xf32>
    tpu.vector_store %arg8[%c0_19, %c0_20, %c0_21, %c0_22], %38 {strides = array<i32>} : memref<1x4x8x8xf32, #tpu.memory_space<vmem>>, vector<1x1x8x8xf32>,
    %39 = vector.extract_strided_slice %30 {offsets = [0, 64], sizes = [8, 8], strides = [1, 1]} : vector<8x96xf32> to vector<8x8xf32>
    %c0_23 = arith.constant 0 : index
    %c0_24 = arith.constant 0 : index
    %c0_25 = arith.constant 0 : index
    %c0_26 = arith.constant 0 : index
    %40 = vector.load %arg9[%c0_23, %c0_24, %c0_25, %c0_26] : memref<1x4x8x8xf32, #tpu.memory_space<vmem>>, vector<1x1x8x8xf32>
    %41 = vector.shape_cast %40 : vector<1x1x8x8xf32> to vector<8x8xf32>
    %42 = vector.shape_cast %39 : vector<8x8xf32> to vector<1x1x8x8xf32>
    tpu.vector_store %arg9[%c0_23, %c0_24, %c0_25, %c0_26], %42 {strides = array<i32>} : memref<1x4x8x8xf32, #tpu.memory_space<vmem>>, vector<1x1x8x8xf32>,
    %43 = vector.extract_strided_slice %30 {offsets = [0, 8], sizes = [8, 8], strides = [1, 1]} : vector<8x96xf32> to vector<8x8xf32>
    %c0_27 = arith.constant 0 : index
    %c1 = arith.constant 1 : index
    %c0_28 = arith.constant 0 : index
    %c0_29 = arith.constant 0 : index
    %44 = vector.load %arg7[%c0_27, %c1, %c0_28, %c0_29] : memref<1x4x8x8xf32, #tpu.memory_space<vmem>>, vector<1x1x8x8xf32>
    %45 = vector.shape_cast %44 : vector<1x1x8x8xf32> to vector<8x8xf32>
    %46 = vector.shape_cast %43 : vector<8x8xf32> to vector<1x1x8x8xf32>
    tpu.vector_store %arg7[%c0_27, %c1, %c0_28, %c0_29], %46 {strides = array<i32>} : memref<1x4x8x8xf32, #tpu.memory_space<vmem>>, vector<1x1x8x8xf32>,
    %47 = vector.extract_strided_slice %30 {offsets = [0, 40], sizes = [8, 8], strides = [1, 1]} : vector<8x96xf32> to vector<8x8xf32>
    %c0_30 = arith.constant 0 : index
    %c1_31 = arith.constant 1 : index
    %c0_32 = arith.constant 0 : index
    %c0_33 = arith.constant 0 : index
    %48 = vector.load %arg8[%c0_30, %c1_31, %c0_32, %c0_33] : memref<1x4x8x8xf32, #tpu.memory_space<vmem>>, vector<1x1x8x8xf32>
    %49 = vector.shape_cast %48 : vector<1x1x8x8xf32> to vector<8x8xf32>
    %50 = vector.shape_cast %47 : vector<8x8xf32> to vector<1x1x8x8xf32>
    tpu.vector_store %arg8[%c0_30, %c1_31, %c0_32, %c0_33], %50 {strides = array<i32>} : memref<1x4x8x8xf32, #tpu.memory_space<vmem>>, vector<1x1x8x8xf32>,
    %51 = vector.extract_strided_slice %30 {offsets = [0, 72], sizes = [8, 8], strides = [1, 1]} : vector<8x96xf32> to vector<8x8xf32>
    %c0_34 = arith.constant 0 : index
    %c1_35 = arith.constant 1 : index
    %c0_36 = arith.constant 0 : index
    %c0_37 = arith.constant 0 : index
    %52 = vector.load %arg9[%c0_34, %c1_35, %c0_36, %c0_37] : memref<1x4x8x8xf32, #tpu.memory_space<vmem>>, vector<1x1x8x8xf32>
    %53 = vector.shape_cast %52 : vector<1x1x8x8xf32> to vector<8x8xf32>
    %54 = vector.shape_cast %51 : vector<8x8xf32> to vector<1x1x8x8xf32>
    tpu.vector_store %arg9[%c0_34, %c1_35, %c0_36, %c0_37], %54 {strides = array<i32>} : memref<1x4x8x8xf32, #tpu.memory_space<vmem>>, vector<1x1x8x8xf32>,
    %55 = vector.extract_strided_slice %30 {offsets = [0, 16], sizes = [8, 8], strides = [1, 1]} : vector<8x96xf32> to vector<8x8xf32>
    %c0_38 = arith.constant 0 : index
    %c2 = arith.constant 2 : index
    %c0_39 = arith.constant 0 : index
    %c0_40 = arith.constant 0 : index
    %56 = vector.load %arg7[%c0_38, %c2, %c0_39, %c0_40] : memref<1x4x8x8xf32, #tpu.memory_space<vmem>>, vector<1x1x8x8xf32>
    %57 = vector.shape_cast %56 : vector<1x1x8x8xf32> to vector<8x8xf32>
    %58 = vector.shape_cast %55 : vector<8x8xf32> to vector<1x1x8x8xf32>
    tpu.vector_store %arg7[%c0_38, %c2, %c0_39, %c0_40], %58 {strides = array<i32>} : memref<1x4x8x8xf32, #tpu.memory_space<vmem>>, vector<1x1x8x8xf32>,
    %59 = vector.extract_strided_slice %30 {offsets = [0, 48], sizes = [8, 8], strides = [1, 1]} : vector<8x96xf32> to vector<8x8xf32>
    %c0_41 = arith.constant 0 : index
    %c2_42 = arith.constant 2 : index
    %c0_43 = arith.constant 0 : index
    %c0_44 = arith.constant 0 : index
    %60 = vector.load %arg8[%c0_41, %c2_42, %c0_43, %c0_44] : memref<1x4x8x8xf32, #tpu.memory_space<vmem>>, vector<1x1x8x8xf32>
    %61 = vector.shape_cast %60 : vector<1x1x8x8xf32> to vector<8x8xf32>
    %62 = vector.shape_cast %59 : vector<8x8xf32> to vector<1x1x8x8xf32>
    tpu.vector_store %arg8[%c0_41, %c2_42, %c0_43, %c0_44], %62 {strides = array<i32>} : memref<1x4x8x8xf32, #tpu.memory_space<vmem>>, vector<1x1x8x8xf32>,
    %63 = vector.extract_strided_slice %30 {offsets = [0, 80], sizes = [8, 8], strides = [1, 1]} : vector<8x96xf32> to vector<8x8xf32>
    %c0_45 = arith.constant 0 : index
    %c2_46 = arith.constant 2 : index
    %c0_47 = arith.constant 0 : index
    %c0_48 = arith.constant 0 : index
    %64 = vector.load %arg9[%c0_45, %c2_46, %c0_47, %c0_48] : memref<1x4x8x8xf32, #tpu.memory_space<vmem>>, vector<1x1x8x8xf32>
    %65 = vector.shape_cast %64 : vector<1x1x8x8xf32> to vector<8x8xf32>
    %66 = vector.shape_cast %63 : vector<8x8xf32> to vector<1x1x8x8xf32>
    tpu.vector_store %arg9[%c0_45, %c2_46, %c0_47, %c0_48], %66 {strides = array<i32>} : memref<1x4x8x8xf32, #tpu.memory_space<vmem>>, vector<1x1x8x8xf32>,
    %67 = vector.extract_strided_slice %30 {offsets = [0, 24], sizes = [8, 8], strides = [1, 1]} : vector<8x96xf32> to vector<8x8xf32>
    %c0_49 = arith.constant 0 : index
    %c3 = arith.constant 3 : index
    %c0_50 = arith.constant 0 : index
    %c0_51 = arith.constant 0 : index
    %68 = vector.load %arg7[%c0_49, %c3, %c0_50, %c0_51] : memref<1x4x8x8xf32, #tpu.memory_space<vmem>>, vector<1x1x8x8xf32>
    %69 = vector.shape_cast %68 : vector<1x1x8x8xf32> to vector<8x8xf32>
    %70 = vector.shape_cast %67 : vector<8x8xf32> to vector<1x1x8x8xf32>
    tpu.vector_store %arg7[%c0_49, %c3, %c0_50, %c0_51], %70 {strides = array<i32>} : memref<1x4x8x8xf32, #tpu.memory_space<vmem>>, vector<1x1x8x8xf32>,
    %71 = vector.extract_strided_slice %30 {offsets = [0, 56], sizes = [8, 8], strides = [1, 1]} : vector<8x96xf32> to vector<8x8xf32>
    %c0_52 = arith.constant 0 : index
    %c3_53 = arith.constant 3 : index
    %c0_54 = arith.constant 0 : index
    %c0_55 = arith.constant 0 : index
    %72 = vector.load %arg8[%c0_52, %c3_53, %c0_54, %c0_55] : memref<1x4x8x8xf32, #tpu.memory_space<vmem>>, vector<1x1x8x8xf32>
    %73 = vector.shape_cast %72 : vector<1x1x8x8xf32> to vector<8x8xf32>
    %74 = vector.shape_cast %71 : vector<8x8xf32> to vector<1x1x8x8xf32>
    tpu.vector_store %arg8[%c0_52, %c3_53, %c0_54, %c0_55], %74 {strides = array<i32>} : memref<1x4x8x8xf32, #tpu.memory_space<vmem>>, vector<1x1x8x8xf32>,
    %75 = vector.extract_strided_slice %30 {offsets = [0, 88], sizes = [8, 8], strides = [1, 1]} : vector<8x96xf32> to vector<8x8xf32>
    %c0_56 = arith.constant 0 : index
    %c3_57 = arith.constant 3 : index
    %c0_58 = arith.constant 0 : index
    %c0_59 = arith.constant 0 : index
    %76 = vector.load %arg9[%c0_56, %c3_57, %c0_58, %c0_59] : memref<1x4x8x8xf32, #tpu.memory_space<vmem>>, vector<1x1x8x8xf32>
    %77 = vector.shape_cast %76 : vector<1x1x8x8xf32> to vector<8x8xf32>
    %78 = vector.shape_cast %75 : vector<8x8xf32> to vector<1x1x8x8xf32>
    tpu.vector_store %arg9[%c0_56, %c3_57, %c0_58, %c0_59], %78 {strides = array<i32>} : memref<1x4x8x8xf32, #tpu.memory_space<vmem>>, vector<1x1x8x8xf32>,
    return
  }
  func.func @transform_0(%arg0: i32, %arg1: i32) -> (i32, i32, i32) {
    %c0_i32 = arith.constant 0 : i32
    %c0_i32_0 = arith.constant 0 : i32
    return %arg0, %arg1, %c0_i32 : i32, i32, i32
  }
  func.func @transform_1(%arg0: i32, %arg1: i32) -> (i32, i32) {
    %c0_i32 = arith.constant 0 : i32
    %c0_i32_0 = arith.constant 0 : i32
    %c0_i32_1 = arith.constant 0 : i32
    return %c0_i32, %c0_i32_0 : i32, i32
  }
  func.func @transform_2(%arg0: i32, %arg1: i32) -> (i32, i32) {
    %c0_i32 = arith.constant 0 : i32
    %c0_i32_0 = arith.constant 0 : i32
    %c0_i32_1 = arith.constant 0 : i32
    return %c0_i32, %c0_i32_0 : i32, i32
  }
  func.func @transform_3(%arg0: i32, %arg1: i32) -> (i32, i32) {
    %c0_i32 = arith.constant 0 : i32
    %c0_i32_0 = arith.constant 0 : i32
    %c0_i32_1 = arith.constant 0 : i32
    return %c0_i32, %c0_i32_0 : i32, i32
  }
  func.func @transform_4(%arg0: i32, %arg1: i32) -> (i32, i32) {
    %c0_i32 = arith.constant 0 : i32
    %c0_i32_0 = arith.constant 0 : i32
    %c0_i32_1 = arith.constant 0 : i32
    return %c0_i32, %c0_i32_0 : i32, i32
  }
  func.func @transform_5(%arg0: i32, %arg1: i32) -> (i32, i32, i32, i32) {
    %c0_i32 = arith.constant 0 : i32
    %c0_i32_0 = arith.constant 0 : i32
    %c0_i32_1 = arith.constant 0 : i32
    return %arg0, %c0_i32, %arg1, %c0_i32_0 : i32, i32, i32, i32
  }
  func.func @transform_6(%arg0: i32, %arg1: i32) -> (i32, i32, i32, i32) {
    %c0_i32 = arith.constant 0 : i32
    %c0_i32_0 = arith.constant 0 : i32
    %c0_i32_1 = arith.constant 0 : i32
    return %arg0, %c0_i32, %arg1, %c0_i32_0 : i32, i32, i32, i32
  }
  func.func @transform_7(%arg0: i32, %arg1: i32) -> (i32, i32, i32, i32) {
    %c0_i32 = arith.constant 0 : i32
    %c0_i32_0 = arith.constant 0 : i32
    %c0_i32_1 = arith.constant 0 : i32
    return %arg0, %c0_i32, %arg1, %c0_i32_0 : i32, i32, i32, i32
  }
}

</mosaic_0001>

<bundles_post_ra>
// kernel: tpu_custom_call.1
= control target key start
LH: loop header
LB: loop body
LE: loop exit
PB: predicated region body
PF: predicated region fallthrough
CT: control target
= control target key end

     0   :  { %s1446_s0 = inlined_call_operand.hbm [shape: f32[2,32,32], index: 0, kind: input, shape index: {}]   ;;  %s1447_s1 = inlined_call_operand.vmem [shape: f32[1,32], index: 1, kind: input, shape index: {}]   ;;  %s1448_s2 = inlined_call_operand.vmem [shape: f32[1,32], index: 2, kind: input, shape index: {}]   ;;  %s1449_s3 = inlined_call_operand.hbm [shape: f32[32,96], index: 3, kind: input, shape index: {}]   ;;  %s1450_s4 = inlined_call_operand.vmem [shape: f32[1,96], index: 4, kind: input, shape index: {}]   ;;  %s1451_s5 = inlined_call_operand.vmem [shape: f32[2,4,32,8], index: 5, kind: output, shape index: {0}]   ;;  %s1452_s6 = inlined_call_operand.vmem [shape: f32[2,4,32,8], index: 6, kind: output, shape index: {1}]   ;;  %s1453_s7 = inlined_call_operand.vmem [shape: f32[2,4,32,8], index: 7, kind: output, shape index: {2}]  }
   0x1   :  { %1459 = sst [smem:[#allocation13_spill]] %s1449_s3 }
   0x2   :  { %1460 = sst [smem:[#allocation14_spill]] %s1451_s5 }
   0x3   :  { %1461 = sst [smem:[#allocation15_spill]] %s1452_s6 }
   0x4   :  { %1462 = sst [smem:[#allocation16_spill]] %s1453_s7 }
   0x5   :  { %13 = vsyncpa [#allocation3], 0 }
   0x6   :  { %15 = vsyncpa [#allocation3 + $0x1], 0 }
   0x7   :  { %16 = vsyncpa [#allocation5], 0  ;;  %s1172_s24 = smov 0   ;;  %s1174_s25 = smov 0  }
   0x8   :  { %s1176_s26 = smov 0   ;;  %s1178_s27 = smov 0  }
   0x9   :  { %s1180_s28 = smov 0   ;;  %s1182_s29 = smov 0  }
   0xa   :  { %s1184_s30 = smov 0   ;;  %s1186_s8 = smov 0  }
   0xb LB: > { %1463 = sst [smem:[#allocation11_spill]] %s1096_s27  ;;  %s824_s9 = sadd.s32 4294967295, %s1112_s8   ;;  %s1112_s8 = sphi %s1186_s8, %s22_s8   ;;  %s1108_s30 = sphi %s1184_s30, %s1489_s30   ;;  %s1104_s29 = sphi %s1182_s29, %s1488_s29   ;;  %s1100_s28 = sphi %s1180_s28, %s1487_s28   ;;  %s1096_s27 = sphi %s1178_s27, %s1486_s27   ;;  %s1092_s26 = sphi %s1176_s26, %s1485_s26   ;;  %s1088_s25 = sphi %s1174_s25, %s1484_s25   ;;  %s1084_s24 = sphi %s1172_s24, %s1483_s24  }
   0xc   : > { %p56_p0 = scmp.ne.s32.totalorder %s1088_s25, %s1084_s24  ;;  %p1214_p1 = scmp.eq.s32.totalorder %s824_s9, 0 }
   0xd   : > { %p826_p2 = scmp.ge.s32.totalorder %s1112_s8, 1  ;;  %p235_p3 = scmp.lt.s32.totalorder %s1112_s8, 9 }
   0xe   : > { %s1464_s10 = scalar_select %p1214_p1, 1, 0 }
   0xf   : > { %p1222_p4 = por %p1214_p1, %p56_p0  ;;  %p1226_p5 = pnand %p826_p2, %p235_p3 }
  0x10   : > { %s1114_s13 = smov [#allocation4]   ;;  %s1468_s3 = sld [smem:[#allocation13_spill]] }
  0x11   : > { %s1465_s11 = scalar_select %p1222_p4, 1, 0 }
  0x12   : > { %s1466_s12 = scalar_select %p1226_p5, 1, 0 }
  0x13   : > { %s253_s14 = sshll.u32 %s1114_s13, 4  ;;  %p890_p6 = pneg %p1226_p5  ;;  %s254_s14 = int_to_ptr.vmem [resolvable:$true] %s253_s14 }
  0x15   : > { %p1234_p7 = pnand %p890_p6, %p1214_p1 }
  0x16   : > { %s984_s18 = scalar_lea.hbm %s1468_s3, 512 }
  0x17   : > { %p985_p8 = scmp.ne.s32.totalorder %s1468_s3, %s984_s18  ;;  %p986_p9 = pneg %p1234_p7 }
  0x18   : > { %p991_p12 = scmp.lt.u32.totalorder %s984_s18, %s1468_s3 }
  0x19   : > { %p987_p10 = pnand %p986_p9, %p985_p8 }
  0x1b   : > { %p988_p11 = pneg %p987_p10 }
  0x1d   : > { %p993_p13 = pnand %p991_p12, %p988_p11 }
  0x1f   : > { %996 = shalt.err (!%p993_p13)
}
  0x20   : > { %s997_s23 = scalar_lea.vmem %s254_s14, 512  ;;  %p1005_p6 = scmp.lt.s32.totalorder %s254_s14, %s254_s14 }
  0x21   : > { %p998_p0 = scmp.ne.s32.totalorder %s254_s14, %s997_s23  ;;  %p1006_p1 = scmp.lt.s32.totalorder %s997_s23, %s997_s23 }
  0x23   : > { %p1000_p2 = pnand %p998_p0, %p986_p9  ;;  %p1007_p4 = por %p1006_p1, %p1005_p6 }
  0x25   : > { %p1001_p3 = pneg %p1000_p2 }
  0x27   : > { %p1008_p5 = pnand %p1007_p4, %p1001_p3 }
  0x29   : > { %1011 = shalt.err (!%p1008_p5)
}
  0x2a   : > { %s1115_s24 = smov 128   ;;  %s1116_s13 = smov 8  }
  0x2b   : > { %893 = dma.hbm_to_vmem [thread:$0]  (!%p1234_p7), %s1468_s3, 512, %s254_s14, [#allocation5], %s1115_s24, %s1115_s24, %s1116_s13  }
  0x2c   : > { %p166_p1 = scmp.eq.s32.totalorder %s824_s9, 7  ;;  %s31_s18 = sadd.s32 1, %s1104_s29 }
  0x2d   : > { %p32_p4 = scmp.ge.s32.totalorder %s31_s18, 4  ;;  %s34_s19 = sadd.s32 1, %s1108_s30 }
  0x2e   : > { %p50_p5 = scmp.ne.s32.totalorder %s1092_s26, %s1088_s25  ;;  %p51_p8 = scmp.eq.s32.totalorder %s1112_s8, 0 }
  0x2f   : > { %s1491_s18 = smov (%p32_p4, %s31_s18), 0  ;;  %s1493_s19 = smov (!%p32_p4, %s34_s19), %s1108_s30 }
  0x30   : > { %1469 = sst [smem:[#allocation12_spill]] %s1491_s18  ;;  %s39_s15 = ssub.s32 %s1104_s29, %s1491_s18 }
  0x31   : > { %s43_s20 = sadd.s32 1, %s1092_s26  ;;  %p36_p9 = scmp.ge.s32.totalorder %s1493_s19, 2 }
  0x32   : > { %p1267_p7 = por %p166_p1, %p50_p5  ;;  %p1271_p10 = por %p51_p8, %p50_p5 }
  0x33   : > { %s270_s21 = sand.u32 1, %s1092_s26   ;;  %s1495_s19 = smov (%p36_p9, %s1493_s19), 0 }
  0x34   : > { %p899_p11 = scmp.lt.s32.totalorder %s1112_s8, 8  ;;  %s829_s22 = sshll.u32 %s270_s21, 3 }
  0x35   : > { %s38_s23 = ssub.s32 %s1108_s30, %s1495_s19  ;;  %s830_s13 = sshll.u32 %s1108_s30, 2 }
  0x36   : > { %s40_s24 = sor.u32 %s39_s15, %s38_s23  ;;  %s279_s16 = sadd.s32 %s1104_s29, %s830_s13 }
  0x37   : > { %p41_p12 = scmp.eq.s32.totalorder %s40_s24, 0  ;;  %s831_s17 = sshll.u32 %s279_s16, 7 }
  0x38   : > { %s274_s3 = scalar_lea.vmem [#allocation2], %s829_s22  ;;  %s1289_s27 = scalar_lea.hbm %s1446_s0, %s831_s17 }
  0x39   : > { %s283_s18 = sshll.u32 %s274_s3, 4  ;;  %p1297_p13 = pnand %p899_p11, %p1271_p10  ;;  %s1291_s18 = int_to_ptr.vmem [resolvable:$true] %s283_s18 }
  0x3a   : > { %s1284_s7 = scalar_select %p41_p12, %s1092_s26, %s43_s20  }
  0x3b   : > { %s271_s3 = scalar_lea.sflag [#allocation3], %s270_s21  ;;  %s1012_s20 = scalar_lea.hbm %s1289_s27, 128 }
  0x3c   : > { %p1013_p0 = scmp.ne.s32.totalorder %s1289_s27, %s1012_s20  ;;  %p1014_p2 = pneg %p1297_p13 }
  0x3d   : > { %s1017_s9 = scalar_lea.hbm %s1446_s0, 1024  ;;  %p1018_p1 = scmp.lt.u32.totalorder %s1289_s27, %s1446_s0 }
  0x3e   : > { %p1015_p3 = pnand %p1014_p2, %p1013_p0  ;;  %p1019_p4 = scmp.lt.u32.totalorder %s1017_s9, %s1012_s20 }
  0x3f   : > { %p1021_p8 = scmp.lt.u32.totalorder %s1012_s20, %s1289_s27 }
  0x40   : > { %p1016_p6 = pneg %p1015_p3  ;;  %p1020_p5 = por %p1019_p4, %p1018_p1 }
  0x42   : > { %p1022_p9 = por %p1021_p8, %p1020_p5 }
  0x44   : > { %p1023_p10 = pnand %p1022_p9, %p1016_p6 }
  0x46   : > { %1026 = shalt.err (!%p1023_p10)
}
  0x47   : > { %s1027_s21 = scalar_lea.vmem %s1291_s18, 128  ;;  %s1117_s24 = smov [#allocation2]  }
  0x48   : > { %p1028_p11 = scmp.ne.s32.totalorder %s1291_s18, %s1027_s21  ;;  %s1032_s13 = sshll.u32 %s1117_s24, 4  ;;  %s1033_s13 = int_to_ptr.vmem [resolvable:$false] %s1032_s13 }
  0x49   : > { %s1034_s16 = scalar_lea.vmem %s1033_s13, 256  ;;  %p1035_p3 = scmp.lt.s32.totalorder %s1291_s18, %s1033_s13 }
  0x4a   : > { %p1030_p12 = pnand %p1028_p11, %p1014_p2  ;;  %p1036_p1 = scmp.lt.s32.totalorder %s1034_s16, %s1027_s21 }
  0x4c   : > { %p1031_p0 = pneg %p1030_p12  ;;  %p1037_p4 = por %p1036_p1, %p1035_p3 }
  0x4e   : > { %p1038_p5 = pnand %p1037_p4, %p1031_p0 }
  0x50   : > { %1041 = shalt.err (!%p1038_p5)
}
  0x51   : > { %897 = dma.hbm_to_vmem [thread:$0]  (!%p1297_p13), %s1289_s27, 128, %s1291_s18, %s271_s3  }
  0x52   : > { %p1473_p6 = scmp.ne.s32.totalorder %s1466_s12, 0 }
  0x53   : > { %s1329_s17 = sand.u32 (!%p1473_p6), 1, %s1088_s25   ;;  %p1474_p2 = scmp.ne.s32.totalorder (!%p1473_p6), %s1465_s11, 0 }
  0x54   : > { %292 = sbr.rel (%p1473_p6) target bundleno = 797 (0x31d), region = 40  ;;  %s833_s20 = sshll.u32 (!%p1473_p6), %s1329_s17, 3 }
  0x55   : > { %s295_s5 = scalar_lea.sflag (!%p1473_p6), [#allocation3], %s1329_s17  ;;  %s298_s6 = scalar_lea.vmem (!%p1473_p6), [#allocation2], %s833_s20 }
  0x5b   : > { %1075 = dma.done.wait (%p1474_p2), %s295_s5, 128  }
  0x5c   : > { %1077 = vsyncadd (%p1474_p2), %s295_s5, 4294967168  ;;  %p1475_p8 = scmp.ne.s32.totalorder %s1464_s10, 0 }
  0x5e   : > { %1079 = dma.done.wait (%p1475_p8), [#allocation5], 512  }
  0x5f   : > { %1081 = vsyncadd (%p1475_p8), [#allocation5], 4294966784  ;;  %vm343_vm0 = vcmask 261120   ;;  %v340_v0 = vld [vmem:[%s298_s6] sm:$0xff]  ;;  %v372_v7 = vld [vmem:[#allocation4] sm:$0xff]  ;;  %v1118_v10 = vmov 0.0|0.0  }
  0x60   : > { %v344_v1 = vsel %vm343_vm0, %v340_v0, 0.0  ;;  %v373_v8 = vld [vmem:[#allocation4 + $0x8] sm:$0xff]  ;;  %v374_v9 = vld [vmem:[#allocation4 + $0x10] sm:$0xff]  ;;  %878 = vmatprep.subr.bf16.mxu0 %v1118_v10  ;;  %v375_v12 = vld [vmem:[#allocation4 + $0x18] sm:$0xff]  ;;  %vm1119_vm1 = vmmov 0   ;;  %v1120_v13 = vmov 0.0  }
  0x61   : > { %345 = vadd.xlane.f32.xlu0 %v344_v1  ;;  %v879_v11 = vpack.c.bf16 %v373_v8, %v372_v7  ;;  %875 = vmatprep.mubr.msk.f32.mxu0 %vm1119_vm1, %v1120_v13  ;;  %v882_v14 = vpack.c.bf16 %v375_v12, %v374_v9  ;;  %v838_v19 = vld [vmem:[%s1447_s1] ss:$0 sm:$0xff]  ;;  %s1351_s18 = sshll.u32 %s1329_s17, 5  ;;  %vm456_vm2 = vcmask 64512   ;;  %s1121_s9 = smov 120  }
  0x62   : > { %v839_v21 = vld [vmem:[%s1448_s2] ss:$0 sm:$0xff]  ;;  %s1122_s22 = smov 96   ;;  %s1357_s23 = scalar_lea.vmem [#allocation6], %s1351_s18 }
  0x63   : > { %880 = vmatpush3.bf16.msra.mxu0 %v879_v11  ;;  %v840_v24 = vld [vmem:[%s1450_s4] ss:$0 sm:$0xff]  ;;  %s1123_s21 = smov 72   ;;  %s1124_s24 = smov 64  }
  0x64   : > { %881 = vmatprep.subr.bf16.mxu0 %v1118_v10  ;;  %s1125_s13 = smov 88   ;;  %s1126_s16 = smov 56  }
  0x65   : > { %s1127_s17 = smov 112   ;;  %s1128_s20 = smov 80  }
  0x66   : > { %s1129_s5 = smov 48   ;;  %s1130_s6 = smov 104  }
  0x67   : > { %883 = vmatpush3.bf16.msra.mxu0 %v882_v14  ;;  %s1131_s27 = smov 40   ;;  %s1364_s10 = scalar_lea.vmem [#allocation7], %s1351_s18 }
  0x68   : > { %s1371_s11 = scalar_lea.vmem [#allocation8], %s1351_s18  ;;  %s1476_s12 = sld [smem:[#allocation11_spill]] (%p1267_p7) }
  0x69   : > { %s854_s18 = sshll.u32 (%p1267_p7), %s1100_s28, 4 }
  0x6e   : > { %s528_s15 = sadd.s32 (%p1267_p7), %s1476_s12, %s854_s18 }
  0x6f   : > { %s855_s3 = sshll.u32 (%p1267_p7), %s528_s15, 3 }
  0xee   : > { %v346_v2 = vpop.xlane.xlu0 %345 }
  0xef   : > { %v348_v3 = vmul.f32 0.03125, %v346_v2 }
  0xf1   : > { %v349_v4 = vsub.f32 %v340_v0, %v348_v3 }
  0xf3   : > { %v350_v5 = vmul.f32 %v349_v4, %v349_v4 }
  0xf5   : > { %v351_v6 = vsel %vm343_vm0, %v350_v5, 0.0 }
  0xf6   : > { %352 = vadd.xlane.f32.xlu0 %v351_v6 }
 0x183   : > { %v353_v15 = vpop.xlane.xlu0 %352 }
 0x184   : > { %v354_v16 = vmul.f32 0.03125, %v353_v15 }
 0x186   : > { %v355_v17 = vadd.f32 1e-05, %v354_v16 }
 0x188   : > { %982 = vrsqrt.f32 %v355_v17 }
 0x192   : > { %v983_v18 = vpop.eup %982 }
 0x193   : > { %v357_v20 = vmul.f32 %v983_v18, %v349_v4 }
 0x195   : > { %v364_v22 = vmul.f32 %v838_v19, %v357_v20 }
 0x197   : > { %v371_v23 = vadd.f32 %v839_v21, %v364_v22 }
 0x199   : > { %876 = vmatmul.mubr.msk.f32.vlgmr.msra.gmra.mrb[0].mxu0 %vm343_vm0, %v371_v23 }
 0x26c   : > { %v452_v25 = vpop.f32.mrb[0].mxu0 }
 0x26d   : > { %v453_v26 = vadd.f32 %v840_v24, %v452_v25  ;;  %v877_v27 = vpop.f32.mrb[1].mxu0 }
 0x26f   : > { %467 = vrot.lane.b32.xlu0 %v453_v26, %s1121_s9  ;;  %459 = vrot.lane.b32.xlu1 %v453_v26, %s1122_s22  ;;  %457 = vst.msk [vmem:[%s1357_s23] sm:$0xff] %vm456_vm2, %v453_v26 }
 0x273   : > { %502 = vrot.lane.b32.xlu0 %v453_v26, %s1123_s21  ;;  %463 = vrot.lane.b32.xlu1 %v453_v26, %s1124_s24  ;;  %s1477_s21 = sld [smem:[#allocation14_spill]] (%p1267_p7) }
 0x276   : > { %v564_v39 = vld [vmem:[%s1357_s23] sm:$0xff] (%p1267_p7) }
 0x277   : > { %472 = vrot.lane.b32.xlu1 %v453_v26, %s1125_s13 }
 0x279   : > { %s530_s24 = scalar_lea.vmem (%p1267_p7), %s1477_s21, %s855_s3 }
 0x27a   : > { %565 = vst [vmem:[%s530_s24] sm:$0xff] (%p1267_p7), %v564_v39 }
 0x27b   : > { %477 = vrot.lane.b32.xlu1 %v453_v26, %s1126_s16 }
 0x27f   : > { %482 = vrot.lane.b32.xlu1 %v453_v26, %s1127_s17 }
 0x283   : > { %487 = vrot.lane.b32.xlu1 %v453_v26, %s1128_s20 }
 0x287   : > { %492 = vrot.lane.b32.xlu1 %v453_v26, %s1129_s5 }
 0x28b   : > { %497 = vrot.lane.b32.xlu1 %v453_v26, %s1130_s6 }
 0x28f   : > { %507 = vrot.lane.b32.xlu1 %v453_v26, %s1131_s27 }
 0x2e1   : > { %v468_v28 = vpop.permute.xlu0 %467  ;;  %v460_v29 = vpop.permute.xlu1 %459 }
 0x2e2   : > { %842 = vst.msk [vmem:[%s1357_s23 + $0x8] sm:$0xff] %vm456_vm2, %v468_v28  ;;  %462 = vst.msk [vmem:[%s1364_s10] sm:$0xff] %vm456_vm2, %v460_v29 }
 0x2e5   : > { %v503_v30 = vpop.permute.xlu0 %502  ;;  %v464_v31 = vpop.permute.xlu1 %463 }
 0x2e6   : > { %849 = vst.msk [vmem:[%s1364_s10 + $0x18] sm:$0xff] %vm456_vm2, %v503_v30  ;;  %466 = vst.msk [vmem:[%s1371_s11] sm:$0xff] %vm456_vm2, %v464_v31 }
 0x2e9   : > { %v473_v32 = vpop.permute.xlu1 %472  ;;  %v566_v40 = vld [vmem:[%s1357_s23 + $0x8] sm:$0xff] (%p1267_p7) }
 0x2ea   : > { %843 = vst.msk [vmem:[%s1364_s10 + $0x8] sm:$0xff] %vm456_vm2, %v473_v32  ;;  %567 = vst [vmem:[%s530_s24 + $0x20] sm:$0xff] (%p1267_p7), %v566_v40 }
 0x2ed   : > { %v478_v33 = vpop.permute.xlu1 %477 }
 0x2ee   : > { %844 = vst.msk [vmem:[%s1371_s11 + $0x8] sm:$0xff] %vm456_vm2, %v478_v33 }
 0x2f1   : > { %v483_v34 = vpop.permute.xlu1 %482 }
 0x2f2   : > { %845 = vst.msk [vmem:[%s1357_s23 + $0x10] sm:$0xff] %vm456_vm2, %v483_v34 }
 0x2f5   : > { %v488_v35 = vpop.permute.xlu1 %487 }
 0x2f6   : > { %846 = vst.msk [vmem:[%s1364_s10 + $0x10] sm:$0xff] %vm456_vm2, %v488_v35 }
 0x2f9   : > { %v493_v36 = vpop.permute.xlu1 %492  ;;  %v568_v41 = vld [vmem:[%s1357_s23 + $0x10] sm:$0xff] (%p1267_p7) }
 0x2fa   : > { %847 = vst.msk [vmem:[%s1371_s11 + $0x10] sm:$0xff] %vm456_vm2, %v493_v36  ;;  %569 = vst [vmem:[%s530_s24 + $0x40] sm:$0xff] (%p1267_p7), %v568_v41 }
 0x2fc   : > { %526 = sbr.rel (!%p1267_p7) target bundleno = 775 (0x307), region = 52 }
 0x2fd   : > { %v498_v37 = vpop.permute.xlu1 %497 }
 0x2fe   : > { %848 = vst.msk [vmem:[%s1357_s23 + $0x18] sm:$0xff] %vm456_vm2, %v498_v37 }
 0x301   : > { %v508_v38 = vpop.permute.xlu1 %507 }
 0x302   : > { %850 = vst.msk [vmem:[%s1371_s11 + $0x18] sm:$0xff] %vm456_vm2, %v508_v38 }
 0x305   : > { %v570_v42 = vld [vmem:[%s1357_s23 + $0x18] sm:$0xff] }
 0x306   : > { %571 = vst [vmem:[%s530_s24 + $0x60] sm:$0xff] %v570_v42 }
 0x307 PF: > { %577 = sbr.rel (!%p1267_p7) target bundleno = 786 (0x312), region = 90  ;;  %s1478_s13 = sld [smem:[#allocation11_spill]] (%p1267_p7)  ;;  %v615_v43 = vld [vmem:[%s1364_s10] sm:$0xff] (%p1267_p7)  ;;  %v617_v44 = vld [vmem:[%s1364_s10 + $0x8] sm:$0xff] (%p1267_p7)  ;;  %v619_v45 = vld [vmem:[%s1364_s10 + $0x10] sm:$0xff] (%p1267_p7) }
 0x308   : > { %s856_s23 = sshll.u32 (%p1267_p7), %s1100_s28, 4  ;;  %v621_v46 = vld [vmem:[%s1364_s10 + $0x18] sm:$0xff] (%p1267_p7)  ;;  %s1479_s6 = sld [smem:[#allocation15_spill]] (%p1267_p7) }
 0x30d   : > { %s579_s16 = sadd.s32 (%p1267_p7), %s1478_s13, %s856_s23 }
 0x30e   : > { %s857_s17 = sshll.u32 %s579_s16, 3 }
 0x30f   : > { %s581_s27 = scalar_lea.vmem %s1479_s6, %s857_s17 }
 0x310   : > { %616 = vst [vmem:[%s581_s27] sm:$0xff] %v615_v43  ;;  %618 = vst [vmem:[%s581_s27 + $0x20] sm:$0xff] %v617_v44 }
 0x311   : > { %620 = vst [vmem:[%s581_s27 + $0x40] sm:$0xff] %v619_v45  ;;  %622 = vst [vmem:[%s581_s27 + $0x60] sm:$0xff] %v621_v46 }
 0x312 PF: > { %628 = sbr.rel (!%p1267_p7) target bundleno = 797 (0x31d), region = 128  ;;  %s1480_s12 = sld [smem:[#allocation11_spill]] (%p1267_p7)  ;;  %v666_v47 = vld [vmem:[%s1371_s11] sm:$0xff] (%p1267_p7)  ;;  %v668_v48 = vld [vmem:[%s1371_s11 + $0x8] sm:$0xff] (%p1267_p7)  ;;  %v670_v49 = vld [vmem:[%s1371_s11 + $0x10] sm:$0xff] (%p1267_p7) }
 0x313   : > { %s858_s10 = sshll.u32 (%p1267_p7), %s1100_s28, 4  ;;  %v672_v50 = vld [vmem:[%s1371_s11 + $0x18] sm:$0xff] (%p1267_p7)  ;;  %s1481_s22 = sld [smem:[#allocation16_spill]] (%p1267_p7) }
 0x318   : > { %s630_s18 = sadd.s32 (%p1267_p7), %s1480_s12, %s858_s10 }
 0x319   : > { %s859_s15 = sshll.u32 %s630_s18, 3 }
 0x31a   : > { %s632_s21 = scalar_lea.vmem %s1481_s22, %s859_s15 }
 0x31b   : > { %667 = vst [vmem:[%s632_s21] sm:$0xff] %v666_v47  ;;  %669 = vst [vmem:[%s632_s21 + $0x20] sm:$0xff] %v668_v48 }
 0x31c   : > { %671 = vst [vmem:[%s632_s21 + $0x40] sm:$0xff] %v670_v49  ;;  %673 = vst [vmem:[%s632_s21 + $0x60] sm:$0xff] %v672_v50 }
 0x31d PF: > { %s22_s8 = sadd.s32 1, %s1112_s8   ;;  %s1482_s14 = sld [smem:[#allocation12_spill]] }
 0x31e   : > { %p19_p7 = scmp.ge.s32.totalorder %s22_s8, 10   ;;  %s1483_s24 = smov %s1088_s25 }
 0x31f   : > { %s1484_s25 = smov %s1092_s26  ;;  %s1485_s26 = smov %s1284_s7 }
 0x320   : > { %s1486_s27 = smov %s1104_s29  ;;  %s1487_s28 = smov %s1108_s30 }
 0x321   : > { %s1489_s30 = smov %s1495_s19  ;;  %21 = sbr.rel (!%p19_p7) target bundleno = 11 (0xb), region = 231 }
 0x323   : > { %s1488_s29 = smov %s1482_s14 }
 0x328   :  { %703 = vsyncpa [#allocation3], 1 }
 0x329   :  { %705 = vsyncpa [#allocation3 + $0x1], 1 }
 0x32a   :  { %706 = vsyncpa [#allocation5], 1 }

</bundles_post_ra>
